<compile_context>
chip_gen: v6e
topology: v6e:2x2x1
jax: 0.10.0
libtpu: 0.0.40
codegen_flags: <defaults>
</compile_context>

<pallas_src>
import functools

import jax
import jax.numpy as jnp
from jax.experimental import pallas as pl
from jax.experimental.pallas import tpu as pltpu

C_PAD = 128  # padded channel (lane) width; hidden_channels must be <= 128


# ------------------------------ Pallas kernels -------------------------------
def _resident_gcn_kernel(a_hbm, x_hbm, w_ref, b_ref, o_ref, a_vmem, h_ref, sem,
                         *, num_layers):
    """grid = (num_layers,).  A_hat lives in a single-buffered VMEM scratch."""
    l = pl.program_id(0)
    last = num_layers - 1

    # One-shot DMAs: A_hat -> resident VMEM scratch, X -> persistent H scratch.
    @pl.when(l == 0)
    def _():
        cp_a = pltpu.make_async_copy(a_hbm, a_vmem, sem.at[0])
        cp_x = pltpu.make_async_copy(x_hbm, h_ref, sem.at[1])
        cp_a.start()
        cp_x.start()
        cp_a.wait()
        cp_x.wait()

    # Dense transform then aggregation, all on the MXU with f32 accumulation.
    z = jnp.dot(h_ref[...], w_ref[0], preferred_element_type=jnp.float32)
    z = z.astype(jnp.bfloat16)
    acc = jnp.dot(a_vmem[...], z, preferred_element_type=jnp.float32) + b_ref[0]

    @pl.when(l < last)            # hidden layers -> ReLU, stays in VMEM scratch
    def _():
        h_ref[...] = jnp.maximum(acc, 0.0).astype(h_ref.dtype)

    @pl.when(l == last)           # output head -> sigmoid, lane-dense bf16 slab
    def _():
        o_ref[...] = jax.nn.sigmoid(acc).astype(o_ref.dtype)


def _streaming_gcn_kernel(a_ref, x_hbm, w_ref, b_ref, o_ref, h_ref, z_ref, sem,
                          *, tm, num_layers):
    """grid = (num_layers, row_tiles).  A_hat row tiles streamed (double-buffered) from HBM."""
    l = pl.program_id(0)          # layer index    (outer, sequential)
    i = pl.program_id(1)          # row-tile index (inner)
    last = num_layers - 1

    # Seed the persistent activation buffer with the node features (once).
    @pl.when((l == 0) & (i == 0))
    def _():
        cp = pltpu.make_async_copy(x_hbm, h_ref, sem.at[0])
        cp.start()
        cp.wait()

    # Hoisted dense transform: Z = H @ W_l, computed once per layer (not per tile).
    @pl.when(i == 0)
    def _():
        z_ref[...] = jnp.dot(
            h_ref[...], w_ref[0], preferred_element_type=jnp.float32
        ).astype(z_ref.dtype)

    # Row-tile aggregation on the MXU: A_hat[tile] @ Z + b_l  (f32 accumulation).
    acc = jnp.dot(a_ref[...], z_ref[...], preferred_element_type=jnp.float32)
    acc = acc + b_ref[0]

    row0 = pl.multiple_of(i * tm, tm)

    @pl.when(l < last)
    def _():
        h_ref[pl.ds(row0, tm), :] = jnp.maximum(acc, 0.0).astype(h_ref.dtype)

    @pl.when(l == last)
    def _():
        o_ref[pl.ds(row0, tm), :] = jax.nn.sigmoid(acc).astype(o_ref.dtype)


# ------------------------------ Glue (plain JAX) ------------------------------
def normalized_adjacency(edge_index, num_nodes):
    """A_hat = D^{-1/2} (A + I) D^{-1/2}, matching PyG gcn_norm defaults.

    Note: duplicate entries in edge_index are collapsed (PyG would sum duplicate
    edge weights); the graphs built in this script contain no duplicates.
    """
    src, dst = edge_index
    a = jnp.zeros((num_nodes, num_nodes), jnp.float32).at[dst, src].set(1.0)
    a = jnp.maximum(a, jnp.eye(num_nodes, dtype=jnp.float32))  # add self-loops
    deg = a.sum(axis=1)
    d_inv_sqrt = jax.lax.rsqrt(deg)
    return a * d_inv_sqrt[:, None] * d_inv_sqrt[None, :]


def _round_up(x, m):
    return (x + m - 1) // m * m


def _vmem_budget_bytes():
    """Generation-aware VMEM budget: physical capacity minus headroom (clamped)."""
    cap = None
    try:
        cap = getattr(pltpu.get_tpu_info(), "vmem_capacity_bytes", None)
    except Exception:
        cap = None
    if not cap or cap <= 0:
        cap = 64 << 20  # conservative default (v7x has the smallest VMEM)
    budget = min(cap - (8 << 20), int(cap * 0.88))
    return int(max(32 << 20, min(budget, 120 << 20)))


def init_params(key, hidden_channels=16, num_layers=2):
    """Deterministic synthetic parameters (GCNConv: weight (C_in, C_out), bias (C_out,))."""
    dims = [1] + [hidden_channels] * num_layers + [1]
    params = []
    for c_in, c_out in zip(dims[:-1], dims[1:]):
        key, kw, kb = jax.random.split(key, 3)
        scale = (6.0 / (c_in + c_out)) ** 0.5  # glorot-ish
        w = jax.random.uniform(kw, (c_in, c_out), jnp.float32, -scale, scale)
        b = 0.01 * jax.random.normal(kb, (c_out,), jnp.float32)
        params.append((w, b))
    return params


def gcn_for_mis_forward(x, edge_index, params, num_nodes, *, force_streaming=False, tm=None):
    """Fused Pallas implementation of GCNForMIS.forward. Returns shape (num_nodes,) f32."""
    num_layers = len(params)
    for w, _ in params:
        assert w.shape[0] <= C_PAD and w.shape[1] <= C_PAD

    n_pad = _round_up(max(num_nodes, 1), C_PAD)

    # Normalized adjacency, zero-padded (padding is mathematically inert), bf16 stream.
    a_hat = normalized_adjacency(edge_index, num_nodes)
    a_pad = (jnp.zeros((n_pad, n_pad), jnp.float32)
             .at[:num_nodes, :num_nodes].set(a_hat).astype(jnp.bfloat16))

    # Node features padded into the 128-lane channel slab (DMA'd once into H scratch).
    x_pad = (jnp.zeros((n_pad, C_PAD), jnp.float32)
             .at[:num_nodes, : x.shape[1]].set(x).astype(jnp.bfloat16))

    # Layer weights / biases stacked so a per-layer BlockSpec selects layer l's slice.
    w_stack = jnp.zeros((num_layers, C_PAD, C_PAD), jnp.float32)
    b_stack = jnp.zeros((num_layers, 1, C_PAD), jnp.float32)
    for idx, (w, b) in enumerate(params):
        w_stack = w_stack.at[idx, : w.shape[0], : w.shape[1]].set(w)
        b_stack = b_stack.at[idx, 0, : b.shape[0]].set(b)
    w_stack = w_stack.astype(jnp.bfloat16)

    # ---- VMEM accounting (footprint is shrunk to fit, not just the limit) ------
    budget = _vmem_budget_bytes()
    bpe = 2  # bf16 bytes / element
    base = (n_pad * C_PAD * bpe                       # H scratch
            + 2 * n_pad * C_PAD * bpe                 # bf16 output slab (2 pipeline bufs)
            + 2 * (C_PAD * C_PAD * bpe + C_PAD * 4)   # W_l / b_l blocks (2 bufs each)
            + n_pad * C_PAD * 4                       # live f32 accumulator value
            + (2 << 20))                              # slack for compiler internals
    resident_bytes = (base
                      + n_pad * n_pad * bpe           # single-buffered resident A_hat
                      + n_pad * C_PAD * bpe)          # live Z value
    use_resident = (not force_streaming) and resident_bytes <= budget

    out_shape = jax.ShapeDtypeStruct((n_pad, C_PAD), jnp.bfloat16)

    if use_resident:
        kernel = functools.partial(_resident_gcn_kernel, num_layers=num_layers)
        out = pl.pallas_call(
            kernel,
            out_shape=out_shape,
            grid_spec=pltpu.PrefetchScalarGridSpec(
                num_scalar_prefetch=0,
                grid=(num_layers,),
                in_specs=[
                    pl.BlockSpec(memory_space=pl.ANY),                     # A_hat (HBM, copied once)
                    pl.BlockSpec(memory_space=pl.ANY),                     # X     (HBM, copied once)
                    pl.BlockSpec((1, C_PAD, C_PAD), lambda l: (l, 0, 0)),  # W_l
                    pl.BlockSpec((1, 1, C_PAD), lambda l: (l, 0, 0)),      # b_l
                ],
                out_specs=pl.BlockSpec((n_pad, C_PAD), lambda l: (0, 0)),  # single flush
                scratch_shapes=[
                    pltpu.VMEM((n_pad, n_pad), jnp.bfloat16),  # resident A_hat
                    pltpu.VMEM((n_pad, C_PAD), jnp.bfloat16),  # H (layer activations)
                    pltpu.SemaphoreType.DMA((2,)),             # A / X one-shot copies
                ],
            ),
            compiler_params=pltpu.CompilerParams(
                dimension_semantics=("arbitrary",),  # layers are inherently sequential
                vmem_limit_bytes=int(budget),
            ),
        )(a_pad, x_pad, w_stack, b_stack)
    else:
        # Streaming fallback: pick the largest row tile (multiple of 128 dividing n_pad)
        # that fits the budget; the A tile stream stays double-buffered for pipelining.
        if tm is None:
            tm = 128
            for k in range(min(n_pad // 128, 8), 0, -1):   # prefer up to 1024-row tiles
                cand = 128 * k
                if n_pad % cand == 0 and (base + n_pad * C_PAD * bpe
                                          + 2 * cand * n_pad * bpe) <= budget:
                    tm = cand
                    break
        assert n_pad % tm == 0, (n_pad, tm)
        n_tiles = n_pad // tm

        kernel = functools.partial(_streaming_gcn_kernel, tm=tm, num_layers=num_layers)
        out = pl.pallas_call(
            kernel,
            out_shape=out_shape,
            grid_spec=pltpu.PrefetchScalarGridSpec(
                num_scalar_prefetch=0,
                grid=(num_layers, n_tiles),
                in_specs=[
                    pl.BlockSpec((tm, n_pad), lambda l, i: (i, 0)),           # A_hat rows
                    pl.BlockSpec(memory_space=pl.ANY),                        # X (HBM)
                    pl.BlockSpec((1, C_PAD, C_PAD), lambda l, i: (l, 0, 0)),  # W_l
                    pl.BlockSpec((1, 1, C_PAD), lambda l, i: (l, 0, 0)),      # b_l
                ],
                out_specs=pl.BlockSpec((n_pad, C_PAD), lambda l, i: (0, 0)),  # single flush
                scratch_shapes=[
                    pltpu.VMEM((n_pad, C_PAD), jnp.bfloat16),  # H  (layer activations)
                    pltpu.VMEM((n_pad, C_PAD), jnp.bfloat16),  # Z = H @ W_l
                    pltpu.SemaphoreType.DMA((1,)),             # X one-shot copy
                ],
            ),
            compiler_params=pltpu.CompilerParams(
                dimension_semantics=("arbitrary", "arbitrary"),
                vmem_limit_bytes=int(budget),
            ),
        )(a_pad, x_pad, w_stack, b_stack)

    return out[:num_nodes, 0].astype(jnp.float32)  # == torch.sigmoid(x).squeeze(-1)


def gcn_for_mis_reference(x, edge_index, params, num_nodes):
    """Plain-JAX f32 reference for correctness checking."""
    a_hat = normalized_adjacency(edge_index, num_nodes)
    h = x
    for w, b in params[:-1]:
        h = jnp.maximum(a_hat @ (h @ w) + b, 0.0)
    w, b = params[-1]
    return jax.nn.sigmoid(a_hat @ (h @ w) + b)[:, 0]


# ---------------------------------- main --------------------------------------
if __name__ == "__main__":
    key = jax.random.PRNGKey(0)

    def make_graph(num_nodes, offsets):
        # Deterministic undirected graph: ring (offset 1) + chords; no duplicate edges.
        src, dst = [], []
        for i in range(num_nodes):
            for off in offsets:
                j = (i + off) % num_nodes
                src += [i, j]
                dst += [j, i]
        return jnp.array([src, dst], dtype=jnp.int32)  # (2, E)

    # ---- Test 1: default path (A_hat VMEM-resident, grid = (num_layers,)) -----
    n1 = 48
    edge_index1 = make_graph(n1, (1, 5))
    key, kx1, kp1 = jax.random.split(key, 3)
    x1 = jax.random.uniform(kx1, (n1, 1), jnp.float32)
    params1 = init_params(kp1, hidden_channels=16, num_layers=2)

    out1 = jax.block_until_ready(gcn_for_mis_forward(x1, edge_index1, params1, n1))
    ref1 = gcn_for_mis_reference(x1, edge_index1, params1, n1)
    assert out1.shape == (n1,)
    # bf16 A_hat / H / W / output with f32 accumulation -> relaxed tolerance.
    assert jnp.allclose(out1, ref1, rtol=2e-2, atol=2e-2), (out1, ref1)

    # ---- Test 2: forced streaming fallback (multi row-tile grid = (3, 3)) -----
    n2 = 300
    edge_index2 = make_graph(n2, (1, 7))
    key, kx2, kp2 = jax.random.split(key, 3)
    x2 = jax.random.uniform(kx2, (n2, 1), jnp.float32)
    params2 = init_params(kp2, hidden_channels=16, num_layers=2)

    out2 = jax.block_until_ready(
        gcn_for_mis_forward(x2, edge_index2, params2, n2, force_streaming=True, tm=128))
    ref2 = gcn_for_mis_reference(x2, edge_index2, params2, n2)
    assert out2.shape == (n2,)
    assert jnp.allclose(out2, ref2, rtol=2e-2, atol=2e-2), (out2, ref2)

    print("KERNEL_OK")
</pallas_src>

<mosaic_0001>
module attributes {stable_mosaic.version = 11 : i64} {
  func.func @_resident_gcn_kernel(%arg0: i32, %arg1: memref<128x128xbf16, #tpu.memory_space<any>>, %arg2: memref<128x128xbf16, #tpu.memory_space<any>>, %arg3: memref<1x128x128xbf16, #tpu.memory_space<vmem>>, %arg4: memref<1x1x128xf32, #tpu.memory_space<vmem>>, %arg5: memref<128x128xbf16, #tpu.memory_space<vmem>>, %arg6: memref<128x128xbf16, #tpu.memory_space<vmem>>, %arg7: memref<128x128xbf16, #tpu.memory_space<vmem>>, %arg8: memref<2x!tpu.dma_semaphore, #tpu.memory_space<semaphore_mem>>) attributes {dimension_semantics = [#tpu.dimension_semantics<arbitrary>], iteration_bounds = array<i64: 3>, scalar_prefetch = 0 : i64, scratch_operands = 3 : i64, tpu.core_type = #tpu.core_type<tc>, window_params = [{}, {}, {transform_indices = @transform_2, window_bounds = array<i64: 1, 128, 128>}, {transform_indices = @transform_3, window_bounds = array<i64: 1, 1, 128>}, {pipeline_mode = #tpu.pipeline_mode<synchronous>, transform_indices = @transform_4, window_bounds = array<i64: 128, 128>}]} {
    %c0_i32 = arith.constant 0 : i32
    %0 = arith.cmpi eq, %arg0, %c0_i32 : i32
    %1 = arith.extui %0 : i1 to i32
    %c0_i32_0 = arith.constant 0 : i32
    %2 = arith.cmpi ne, %1, %c0_i32_0 : i32
    scf.if %2 {
      %c0_i32_14 = arith.constant 0 : i32
      %20 = tpu.memref_slice %arg8[%c0_i32_14] : memref<2x!tpu.dma_semaphore, #tpu.memory_space<semaphore_mem>> -> memref<1x!tpu.dma_semaphore, #tpu.memory_space<semaphore_mem>>
      %21 = tpu.memref_squeeze %20 : memref<1x!tpu.dma_semaphore, #tpu.memory_space<semaphore_mem>> -> memref<!tpu.dma_semaphore, #tpu.memory_space<semaphore_mem>>
      tpu.enqueue_dma source(%arg1 : memref<128x128xbf16, #tpu.memory_space<any>>) target(%arg6 : memref<128x128xbf16, #tpu.memory_space<vmem>>) target_semaphore(%21 : memref<!tpu.dma_semaphore, #tpu.memory_space<semaphore_mem>>)
      %c1_i32 = arith.constant 1 : i32
      %22 = tpu.memref_slice %arg8[%c1_i32] : memref<2x!tpu.dma_semaphore, #tpu.memory_space<semaphore_mem>> -> memref<1x!tpu.dma_semaphore, #tpu.memory_space<semaphore_mem>>
      %23 = tpu.memref_squeeze %22 : memref<1x!tpu.dma_semaphore, #tpu.memory_space<semaphore_mem>> -> memref<!tpu.dma_semaphore, #tpu.memory_space<semaphore_mem>>
      tpu.enqueue_dma source(%arg2 : memref<128x128xbf16, #tpu.memory_space<any>>) target(%arg7 : memref<128x128xbf16, #tpu.memory_space<vmem>>) target_semaphore(%23 : memref<!tpu.dma_semaphore, #tpu.memory_space<semaphore_mem>>)
      %c0_i32_15 = arith.constant 0 : i32
      %24 = tpu.memref_slice %arg8[%c0_i32_15] : memref<2x!tpu.dma_semaphore, #tpu.memory_space<semaphore_mem>> -> memref<1x!tpu.dma_semaphore, #tpu.memory_space<semaphore_mem>>
      %25 = tpu.memref_squeeze %24 : memref<1x!tpu.dma_semaphore, #tpu.memory_space<semaphore_mem>> -> memref<!tpu.dma_semaphore, #tpu.memory_space<semaphore_mem>>
      tpu.wait_dma2 semaphore(%25 : memref<!tpu.dma_semaphore, #tpu.memory_space<semaphore_mem>>) src(%arg1 : memref<128x128xbf16, #tpu.memory_space<any>>) dst(%arg6 : memref<128x128xbf16, #tpu.memory_space<vmem>>)
      %c1_i32_16 = arith.constant 1 : i32
      %26 = tpu.memref_slice %arg8[%c1_i32_16] : memref<2x!tpu.dma_semaphore, #tpu.memory_space<semaphore_mem>> -> memref<1x!tpu.dma_semaphore, #tpu.memory_space<semaphore_mem>>
      %27 = tpu.memref_squeeze %26 : memref<1x!tpu.dma_semaphore, #tpu.memory_space<semaphore_mem>> -> memref<!tpu.dma_semaphore, #tpu.memory_space<semaphore_mem>>
      tpu.wait_dma2 semaphore(%27 : memref<!tpu.dma_semaphore, #tpu.memory_space<semaphore_mem>>) src(%arg2 : memref<128x128xbf16, #tpu.memory_space<any>>) dst(%arg7 : memref<128x128xbf16, #tpu.memory_space<vmem>>)
    } else {
    }
    %c0 = arith.constant 0 : index
    %c0_1 = arith.constant 0 : index
    %3 = vector.load %arg7[%c0, %c0_1] : memref<128x128xbf16, #tpu.memory_space<vmem>>, vector<128x128xbf16>
    %c0_2 = arith.constant 0 : index
    %c0_3 = arith.constant 0 : index
    %c0_4 = arith.constant 0 : index
    %4 = vector.load %arg3[%c0_2, %c0_3, %c0_4] : memref<1x128x128xbf16, #tpu.memory_space<vmem>>, vector<1x128x128xbf16>
    %5 = vector.shape_cast %4 : vector<1x128x128xbf16> to vector<128x128xbf16>
    %cst = arith.constant dense<0.000000e+00> : vector<128x128xf32>
    %6 = tpu.matmul %3, %5, %cst {dimension_numbers = #tpu.dot_dimension_numbers<[1], [0], [0], [1], [0, 0, 1, 1], [], []>} : vector<128x128xbf16>, vector<128x128xbf16>, vector<128x128xf32> -> vector<128x128xf32>
    %7 = arith.truncf %6 : vector<128x128xf32> to vector<128x128xbf16>
    %c0_5 = arith.constant 0 : index
    %c0_6 = arith.constant 0 : index
    %8 = vector.load %arg6[%c0_5, %c0_6] : memref<128x128xbf16, #tpu.memory_space<vmem>>, vector<128x128xbf16>
    %cst_7 = arith.constant dense<0.000000e+00> : vector<128x128xf32>
    %9 = tpu.matmul %8, %7, %cst_7 {dimension_numbers = #tpu.dot_dimension_numbers<[1], [0], [0], [1], [0, 0, 1, 1], [], []>} : vector<128x128xbf16>, vector<128x128xbf16>, vector<128x128xf32> -> vector<128x128xf32>
    %c0_8 = arith.constant 0 : index
    %c0_9 = arith.constant 0 : index
    %c0_10 = arith.constant 0 : index
    %10 = vector.load %arg4[%c0_8, %c0_9, %c0_10] : memref<1x1x128xf32, #tpu.memory_space<vmem>>, vector<1x1x128xf32>
    %11 = vector.shape_cast %10 : vector<1x1x128xf32> to vector<1x128xf32>
    %12 = vector.broadcast %11 : vector<1x128xf32> to vector<128x128xf32>
    %13 = arith.addf %9, %12 : vector<128x128xf32>
    %c2_i32 = arith.constant 2 : i32
    %14 = arith.cmpi slt, %arg0, %c2_i32 : i32
    %15 = arith.extui %14 : i1 to i32
    %c0_i32_11 = arith.constant 0 : i32
    %16 = arith.cmpi ne, %15, %c0_i32_11 : i32
    scf.if %16 {
      %cst_14 = arith.constant 0.000000e+00 : f32
      %20 = vector.broadcast %cst_14 : f32 to vector<128x128xf32>
      %21 = arith.maximumf %13, %20 : vector<128x128xf32>
      %22 = arith.truncf %21 : vector<128x128xf32> to vector<128x128xbf16>
      %c0_15 = arith.constant 0 : index
      %c0_16 = arith.constant 0 : index
      %23 = vector.load %arg7[%c0_15, %c0_16] : memref<128x128xbf16, #tpu.memory_space<vmem>>, vector<128x128xbf16>
      tpu.vector_store %arg7[%c0_15, %c0_16], %22 {strides = array<i32>} : memref<128x128xbf16, #tpu.memory_space<vmem>>, vector<128x128xbf16>,
    } else {
    }
    %c2_i32_12 = arith.constant 2 : i32
    %17 = arith.cmpi eq, %arg0, %c2_i32_12 : i32
    %18 = arith.extui %17 : i1 to i32
    %c0_i32_13 = arith.constant 0 : i32
    %19 = arith.cmpi ne, %18, %c0_i32_13 : i32
    scf.if %19 {
      %20 = arith.negf %13 : vector<128x128xf32>
      %21 = math.exp %20 : vector<128x128xf32>
      %cst_14 = arith.constant 1.000000e+00 : f32
      %22 = vector.broadcast %cst_14 : f32 to vector<128x128xf32>
      %23 = arith.addf %22, %21 : vector<128x128xf32>
      %24 = arith.divf %22, %23 : vector<128x128xf32>
      %25 = arith.truncf %24 : vector<128x128xf32> to vector<128x128xbf16>
      %c0_15 = arith.constant 0 : index
      %c0_16 = arith.constant 0 : index
      %26 = vector.load %arg5[%c0_15, %c0_16] : memref<128x128xbf16, #tpu.memory_space<vmem>>, vector<128x128xbf16>
      tpu.vector_store %arg5[%c0_15, %c0_16], %25 {strides = array<i32>} : memref<128x128xbf16, #tpu.memory_space<vmem>>, vector<128x128xbf16>,
    } else {
    }
    return
  }
  func.func @transform_2(%arg0: i32) -> (i32, i32, i32) {
    %c0_i32 = arith.constant 0 : i32
    %c0_i32_0 = arith.constant 0 : i32
    %c0_i32_1 = arith.constant 0 : i32
    return %arg0, %c0_i32, %c0_i32_0 : i32, i32, i32
  }
  func.func @transform_3(%arg0: i32) -> (i32, i32, i32) {
    %c0_i32 = arith.constant 0 : i32
    %c0_i32_0 = arith.constant 0 : i32
    %c0_i32_1 = arith.constant 0 : i32
    return %arg0, %c0_i32, %c0_i32_0 : i32, i32, i32
  }
  func.func @transform_4(%arg0: i32) -> (i32, i32) {
    %c0_i32 = arith.constant 0 : i32
    %c0_i32_0 = arith.constant 0 : i32
    %c0_i32_1 = arith.constant 0 : i32
    return %c0_i32, %c0_i32_0 : i32, i32
  }
}

</mosaic_0001>

<bundles_post_ra>
// kernel: tpu_custom_call.1
= control target key start
LH: loop header
LB: loop body
LE: loop exit
PB: predicated region body
PF: predicated region fallthrough
CT: control target
= control target key end

     0   :  { %9 = vsyncpa [#allocation6], 0  ;;  %s1795_s0 = inlined_call_operand.hbm [shape: bf16[128,128], index: 0, kind: input, shape index: {}]   ;;  %s1796_s1 = inlined_call_operand.hbm [shape: bf16[128,128], index: 1, kind: input, shape index: {}]   ;;  %s1797_s2 = inlined_call_operand.hbm [shape: bf16[3,128,128], index: 2, kind: input, shape index: {}]   ;;  %s1798_s3 = inlined_call_operand.vmem [shape: f32[3,1,128], index: 3, kind: input, shape index: {}]   ;;  %s1799_s4 = inlined_call_operand.hbm [shape: bf16[128,128], index: 4, kind: output, shape index: {}]  }
   0x1   :  { %11 = vsyncpa [#allocation6 + $0x1], 0 }
   0x2   :  { %12 = vsyncpa [#allocation7], 0  ;;  %s1602_s15 = smov 0   ;;  %s1604_s16 = smov 0  }
   0x3   :  { %s1606_s17 = smov 0   ;;  %s1608_s18 = smov 0  }
   0x4 LB: > { %s1621_s19 = sadd.s32 4294967295, %s1567_s18   ;;  %s1624_s20 = sadd.s32 1, %s1567_s18   ;;  %s1567_s18 = sphi %s1608_s18, %s1817_s18   ;;  %s1563_s17 = sphi %s1606_s17, %s1816_s17   ;;  %s1559_s16 = sphi %s1604_s16, %s1815_s16   ;;  %s1555_s15 = sphi %s1602_s15, %s1814_s15  }
   0x5   : > { %s22_s21 = ssub.s32 %s1567_s18, %s1624_s20  ;;  %s25_s22 = sadd.s32 1, %s1563_s17 }
   0x6   : > { %p23_p0 = scmp.eq.s32.totalorder %s22_s21, 0  ;;  %p32_p1 = scmp.ne.s32.totalorder %s1563_s17, %s1559_s16 }
   0x7   : > { %p33_p2 = scmp.eq.s32.totalorder %s1567_s18, 0  ;;  %p38_p3 = scmp.ne.s32.totalorder %s1559_s16, %s1555_s15 }
   0x8   : > { %s1634_s23 = scalar_select %p23_p0, %s1563_s17, %s25_s22  }
   0x9   : > { %p34_p4 = por %p33_p2, %p32_p1  ;;  %p1800_p5 = scmp.eq.s32.totalorder %s1621_s19, 0 }
   0xa   : > { %p1290_p6 = scmp.lt.s32.totalorder %s1567_s18, 3  ;;  %s109_s25 = sand.u32 1, %s1563_s17  }
   0xb   : > { %p1640_p7 = por %p1800_p5, %p38_p3  ;;  %s965_s26 = sshll.u32 %s109_s25, 6 }
   0xc   : > { %s1052_s27 = sshll.u32 %s1567_s18, 10  ;;  %s113_s5 = scalar_lea.vmem [#allocation5], %s965_s26 }
   0xd   : > { %s1802_s24 = scalar_select %p1640_p7, 1, 0 }
   0xe   : > { %s1649_s30 = scalar_lea.hbm %s1797_s2, %s1052_s27  ;;  %s120_s6 = sshll.u32 %s113_s5, 4  ;;  %s1651_s6 = int_to_ptr.vmem [resolvable:$true] %s120_s6 }
   0xf   : > { %p1653_p8 = pnand %p1290_p6, %p34_p4  ;;  %s1658_s8 = scalar_lea.sflag [#allocation6], %s109_s25 }
  0x10   : > { %s1421_s9 = scalar_lea.hbm %s1649_s30, 1024  ;;  %s1426_s12 = scalar_lea.hbm %s1797_s2, 3072 }
  0x11   : > { %p1422_p10 = scmp.ne.s32.totalorder %s1649_s30, %s1421_s9  ;;  %p1423_p11 = pneg %p1653_p8 }
  0x12   : > { %p1427_p0 = scmp.lt.s32.totalorder %s1649_s30, %s1797_s2  ;;  %p1428_p1 = scmp.lt.s32.totalorder %s1426_s12, %s1421_s9 }
  0x13   : > { %p1424_p12 = pnand %p1423_p11, %p1422_p10 }
  0x14   : > { %p1429_p2 = por %p1428_p1, %p1427_p0 }
  0x15   : > { %p1425_p13 = pneg %p1424_p12 }
  0x17   : > { %p1430_p3 = pnand %p1429_p2, %p1425_p13 }
  0x19   : > { %1433 = shalt.err (!%p1430_p3)
}
  0x1a   : > { %s1434_s15 = scalar_lea.vmem %s1651_s6, 1024  ;;  %s1569_s21 = smov [#allocation5]  }
  0x1b   : > { %p1435_p4 = scmp.ne.s32.totalorder %s1651_s6, %s1434_s15  ;;  %s1439_s22 = sshll.u32 %s1569_s21, 4  ;;  %s1440_s22 = int_to_ptr.vmem [resolvable:$false] %s1439_s22 }
  0x1c   : > { %s1441_s25 = scalar_lea.vmem %s1440_s22, 2048  ;;  %p1442_p12 = scmp.lt.s32.totalorder %s1651_s6, %s1440_s22 }
  0x1d   : > { %p1437_p6 = pnand %p1435_p4, %p1423_p11  ;;  %p1443_p5 = scmp.lt.s32.totalorder %s1441_s25, %s1434_s15 }
  0x1f   : > { %p1438_p10 = pneg %p1437_p6  ;;  %p1444_p9 = por %p1443_p5, %p1442_p12 }
  0x21   : > { %p1445_p7 = pnand %p1444_p9, %p1438_p10 }
  0x23   : > { %1448 = shalt.err (!%p1445_p7)
}
  0x24   : > { %s1570_s26 = smov 64   ;;  %s1571_s27 = smov 4  }
  0x25   : > { %1289 = dma.hbm_to_vmem [thread:$0]  (!%p1653_p8), %s1649_s30, 1024, %s1651_s6, %s1658_s8, %s1570_s26, %s1570_s26, %s1571_s27  }
  0x26   : > { %p134_p11 = scmp.lt.s32.totalorder %s1567_s18, 4  ;;  %p1804_p13 = scmp.ge.s32.totalorder %s1567_s18, 1 }
  0x28   : > { %p135_p0 = pnand %p1804_p13, %p134_p11 }
  0x29   : > { %s140_s28 = sand.u32 (!%p135_p0), 1, %s1559_s16   ;;  %p1805_p5 = scmp.ne.s32.totalorder (!%p135_p0), %s1802_s24, 0 }
  0x2a   : > { %138 = sbr.rel (%p135_p0) target bundleno = 677 (0x2a5), region = 28  ;;  %s969_s29 = sshll.u32 (!%p135_p0), %s140_s28, 6 }
  0x2b   : > { %s141_s5 = scalar_lea.sflag (!%p135_p0), [#allocation6], %s140_s28  ;;  %s1683_s9 = scalar_lea.vmem (!%p135_p0), [#allocation5], %s969_s29 }
  0x2f   : > { %1538 = dma.done.wait (%p1805_p5), %s141_s5, 1024  }
  0x30   : > { %1540 = vsyncadd (%p1805_p5), %s141_s5, 4294966272  ;;  %p163_p7 = scmp.lt.s32.totalorder %s1621_s19, 2  ;;  %s1572_s18 = smov [#allocation2]  }
  0x31   : > { %s178_s6 = sshll.u32 %s1572_s18, 4  ;;  %s1573_s7 = smov [#allocation3]   ;;  %s179_s6 = int_to_ptr.vmem [resolvable:$true] %s178_s6 }
  0x32   : > { %s1691_s30 = scalar_select %p163_p7, %s1621_s19, 2 }
  0x33   : > { %s190_s8 = sshll.u32 %s1573_s7, 4  ;;  %s1459_s13 = scalar_lea.vmem %s179_s6, 1024  ;;  %s191_s8 = int_to_ptr.vmem [resolvable:$true] %s190_s8 }
  0x34   : > { %s165_s12 = scalar_lea.vmem %s1798_s3, %s1691_s30  ;;  %p1460_p8 = scmp.ne.s32.totalorder %s179_s6, %s1459_s13 }
  0x35   : > { %p1806_p9 = scmp.eq.s32.totalorder %s1621_s19, 0  ;;  %p1466_p3 = scmp.lt.s32.totalorder %s179_s6, %s179_s6 }
  0x36   : > { %p1467_p4 = scmp.lt.s32.totalorder %s1459_s13, %s1459_s13 }
  0x37   : > { %p1461_p1 = pnand %p1460_p8, %p1806_p9 }
  0x38   : > { %p1468_p6 = por %p1467_p4, %p1466_p3 }
  0x39   : > { %p1462_p2 = pneg %p1461_p1 }
  0x3b   : > { %p1469_p10 = pnand %p1468_p6, %p1462_p2 }
  0x3d   : > { %1472 = shalt.err (!%p1469_p10)  }
  0x3e   : > { %p1807_p12 = pmov %p1806_p9  ;;  %s1483_s15 = scalar_lea.vmem %s191_s8, 1024 }
  0x3f   : > { %p1484_p11 = scmp.ne.s32.totalorder %s191_s8, %s1483_s15  ;;  %p1808_p13 = pmov %p1806_p9 }
  0x40   : > { %1278 = dma.hbm_to_vmem [thread:$0]  (%p1807_p12), %s1795_s0, 1024, %s179_s6, [#allocation4] }
  0x41   : > { %p1485_p0 = pnand %p1484_p11, %p1808_p13  ;;  %p1490_p7 = scmp.lt.s32.totalorder %s191_s8, %s191_s8 }
  0x42   : > { %p1491_p8 = scmp.lt.s32.totalorder %s1483_s15, %s1483_s15 }
  0x43   : > { %p1486_p5 = pneg %p1485_p0 }
  0x44   : > { %p1492_p9 = por %p1491_p8, %p1490_p7 }
  0x46   : > { %p1493_p1 = pnand %p1492_p9, %p1486_p5 }
  0x48   : > { %1496 = shalt.err (!%p1493_p1)  }
  0x49   : > { %p1809_p2 = pmov %p1807_p12 }
  0x4b   : > { %1279 = dma.hbm_to_vmem [thread:$0]  (%p1809_p2), %s1796_s1, 1024, %s191_s8, [#allocation4 + $0x1] }
  0x4c   : > { %p1810_p3 = pmov %p1809_p2 }
  0x4d   : > { %p1811_p4 = pmov %p1809_p2 }
  0x4e   : > { %1542 = dma.done.wait (%p1810_p3), [#allocation4], 1024 }
  0x4f   : > { %1544 = vsyncadd (%p1811_p4), [#allocation4], 4294966272  ;;  %p1812_p6 = pmov %p1809_p2 }
  0x50   : > { %p1813_p10 = pmov %p1809_p2 }
  0x51   : > { %1546 = dma.done.wait (%p1812_p6), [#allocation4 + $0x1], 1024 }
  0x52   : > { %1548 = vsyncadd (%p1813_p10), [#allocation4 + $0x1], 4294966272  ;;  %v1333_v0 = vld [vmem:[%s1683_s9 + $0x38] sm:$0xff]   ;;  %v1334_v1 = vld [vmem:[%s1683_s9 + $0x30] sm:$0xff]   ;;  %p996_p12 = scmp.ge.s32.totalorder %s1621_s19, 2 }
  0x53   : > { %1211 = vmatprep.subr.bf16.mxu0 %v1333_v0  ;;  %v1335_v2 = vld [vmem:[%s1683_s9 + $0x28] sm:$0xff]   ;;  %v1336_v3 = vld [vmem:[%s1683_s9 + $0x20] sm:$0xff]   ;;  %v1337_v5 = vld [vmem:[%s1683_s9 + $0x18] sm:$0xff]  }
  0x54   : > { %1212 = vmatpush3.bf16.msra.mxu0 %v1333_v0  ;;  %v1341_v4 = vld [vmem:[#allocation3] sm:$0xff]   ;;  %v1338_v6 = vld [vmem:[%s1683_s9 + $0x10] sm:$0xff]   ;;  %v1339_v7 = vld [vmem:[%s1683_s9 + $0x8] sm:$0xff]  }
  0x55   : > { %1213 = vmatprep.subr.bf16.mxu0 %v1334_v1  ;;  %1227 = vmatprep.mubr.bf16.mxu0 %v1341_v4  ;;  %v1340_v8 = vld [vmem:[%s1683_s9] sm:$0xff]   ;;  %v1342_v9 = vld [vmem:[#allocation3 + $0x8] sm:$0xff]   ;;  %v1343_v10 = vld [vmem:[#allocation3 + $0x10] sm:$0xff]  }
  0x56   : > { %v1344_v11 = vld [vmem:[#allocation3 + $0x18] sm:$0xff]   ;;  %v1345_v12 = vld [vmem:[#allocation3 + $0x20] sm:$0xff]   ;;  %v1346_v13 = vld [vmem:[#allocation3 + $0x28] sm:$0xff]  }
  0x57   : > { %v1347_v14 = vld [vmem:[#allocation3 + $0x30] sm:$0xff]   ;;  %v1348_v15 = vld [vmem:[#allocation3 + $0x38] sm:$0xff]   ;;  %v1349_v16 = vld [vmem:[#allocation2] sm:$0xff]  }
  0x58   : > { %1214 = vmatpush3.bf16.msra.mxu0 %v1334_v1  ;;  %1259 = vmatprep.mubr.bf16.mxu1 %v1349_v16  ;;  %v1350_v41 = vld [vmem:[#allocation2 + $0x8] sm:$0xff]   ;;  %v1351_v42 = vld [vmem:[#allocation2 + $0x10] sm:$0xff]   ;;  %v1352_v43 = vld [vmem:[#allocation2 + $0x18] sm:$0xff]  }
  0x59   : > { %1215 = vmatprep.subr.bf16.mxu0 %v1335_v2  ;;  %v1353_v44 = vld [vmem:[#allocation2 + $0x20] sm:$0xff]   ;;  %v1354_v45 = vld [vmem:[#allocation2 + $0x28] sm:$0xff]   ;;  %v1355_v46 = vld [vmem:[#allocation2 + $0x30] sm:$0xff]  }
  0x5a   : > { %v1356_v47 = vld [vmem:[#allocation2 + $0x38] sm:$0xff]   ;;  %v987_v48 = vld [vmem:[%s165_s12] ss:$0 sm:$0xff] }
  0x5c   : > { %1216 = vmatpush3.bf16.msra.mxu0 %v1335_v2 }
  0x5d   : > { %1217 = vmatprep.subr.bf16.mxu0 %v1336_v3 }
  0x60   : > { %1218 = vmatpush3.bf16.msra.mxu0 %v1336_v3 }
  0x61   : > { %1219 = vmatprep.subr.bf16.mxu0 %v1337_v5 }
  0x64   : > { %1220 = vmatpush3.bf16.msra.mxu0 %v1337_v5 }
  0x65   : > { %1221 = vmatprep.subr.bf16.mxu0 %v1338_v6 }
  0x68   : > { %1222 = vmatpush3.bf16.msra.mxu0 %v1338_v6 }
  0x69   : > { %1223 = vmatprep.subr.bf16.mxu0 %v1339_v7 }
  0x6c   : > { %1224 = vmatpush3.bf16.msra.mxu0 %v1339_v7 }
  0x6d   : > { %1225 = vmatprep.subr.bf16.mxu0 %v1340_v8 }
  0x70   : > { %1226 = vmatpush3.bf16.msra.mxu0 %v1340_v8 }
  0x73   : > { %1228 = vmatmul.mubr.bf16.vlgmr.msra.gmra.mxu0 %v1342_v9 }
  0x74   : > { %1231 = vmatprep.mubr.bf16.mxu0 %v1343_v10 }
  0x7b   : > { %1232 = vmatmul.mubr.bf16.gmra.mxu0 %v1344_v11 }
  0x7c   : > { %1235 = vmatprep.mubr.bf16.mxu0 %v1345_v12 }
  0x83   : > { %1236 = vmatmul.mubr.bf16.gmra.mxu0 %v1346_v13 }
  0x84   : > { %1239 = vmatprep.mubr.bf16.mxu0 %v1347_v14 }
  0x8b   : > { %1240 = vmatmul.mubr.bf16.gmra.mxu0 %v1348_v15 }
 0x133   : > { %v1229_v17 = vpop.f32.mrf.mxu0 }
 0x135   : > { %v362_v18 = vpop.f32.mrf.mxu0 }
 0x137   : > { %v1230_v19 = vpop.f32.mrf.mxu0 }
 0x138   : > { %v426_v39 = vpack.c.bf16 %v1230_v19, %v1229_v17 }
 0x139   : > { %v365_v20 = vpop.f32.mrf.mxu0 }
 0x13a   : > { %v425_v40 = vpack.c.bf16 %v365_v20, %v362_v18 }
 0x13b   : > { %v1233_v21 = vpop.f32.mrf.mxu0 }
 0x13d   : > { %v378_v22 = vpop.f32.mrf.mxu0 }
 0x13f   : > { %v1234_v23 = vpop.f32.mrf.mxu0 }
 0x140   : > { %v428_v37 = vpack.c.bf16 %v1234_v23, %v1233_v21 }
 0x141   : > { %v381_v24 = vpop.f32.mrf.mxu0 }
 0x142   : > { %v427_v38 = vpack.c.bf16 %v381_v24, %v378_v22 }
 0x143   : > { %v1237_v25 = vpop.f32.mrf.mxu0 }
 0x145   : > { %v394_v26 = vpop.f32.mrf.mxu0 }
 0x147   : > { %v1238_v27 = vpop.f32.mrf.mxu0 }
 0x148   : > { %v430_v35 = vpack.c.bf16 %v1238_v27, %v1237_v25 }
 0x149   : > { %v397_v28 = vpop.f32.mrf.mxu0 }
 0x14a   : > { %v429_v36 = vpack.c.bf16 %v397_v28, %v394_v26 }
 0x14b   : > { %v1241_v29 = vpop.f32.mrf.mxu0 }
 0x14d   : > { %v410_v30 = vpop.f32.mrf.mxu0 }
 0x14f   : > { %v1242_v31 = vpop.f32.mrf.mxu0 }
 0x150   : > { %v432_v32 = vpack.c.bf16 %v1242_v31, %v1241_v29 }
 0x151   : > { %v413_v33 = vpop.f32.mrf.mxu0 }
 0x152   : > { %v431_v34 = vpack.c.bf16 %v413_v33, %v410_v30  ;;  %1243 = vmatprep.subr.bf16.mxu1 %v432_v32 }
 0x153   : > { %1244 = vmatpush3.bf16.msra.mxu1 %v432_v32 }
 0x154   : > { %1245 = vmatprep.subr.bf16.mxu1 %v431_v34 }
 0x157   : > { %1246 = vmatpush3.bf16.msra.mxu1 %v431_v34 }
 0x158   : > { %1247 = vmatprep.subr.bf16.mxu1 %v430_v35 }
 0x15b   : > { %1248 = vmatpush3.bf16.msra.mxu1 %v430_v35 }
 0x15c   : > { %1249 = vmatprep.subr.bf16.mxu1 %v429_v36 }
 0x15f   : > { %1250 = vmatpush3.bf16.msra.mxu1 %v429_v36 }
 0x160   : > { %1251 = vmatprep.subr.bf16.mxu1 %v428_v37 }
 0x163   : > { %1252 = vmatpush3.bf16.msra.mxu1 %v428_v37 }
 0x164   : > { %1253 = vmatprep.subr.bf16.mxu1 %v427_v38 }
 0x167   : > { %1254 = vmatpush3.bf16.msra.mxu1 %v427_v38 }
 0x168   : > { %1255 = vmatprep.subr.bf16.mxu1 %v426_v39 }
 0x16b   : > { %1256 = vmatpush3.bf16.msra.mxu1 %v426_v39 }
 0x16c   : > { %1257 = vmatprep.subr.bf16.mxu1 %v425_v40 }
 0x16f   : > { %1258 = vmatpush3.bf16.msra.mxu1 %v425_v40 }
 0x172   : > { %1260 = vmatmul.mubr.bf16.vlgmr.msra.gmra.mxu1 %v1350_v41 }
 0x173   : > { %1263 = vmatprep.mubr.bf16.mxu1 %v1351_v42 }
 0x17a   : > { %1264 = vmatmul.mubr.bf16.gmra.mxu1 %v1352_v43 }
 0x17b   : > { %1267 = vmatprep.mubr.bf16.mxu1 %v1353_v44 }
 0x182   : > { %1268 = vmatmul.mubr.bf16.gmra.mxu1 %v1354_v45 }
 0x183   : > { %1271 = vmatprep.mubr.bf16.mxu1 %v1355_v46 }
 0x18a   : > { %1272 = vmatmul.mubr.bf16.gmra.mxu1 %v1356_v47 }
 0x232   : > { %v1261_v49 = vpop.f32.mrf.mxu1 }
 0x233   : > { %v1732_v50 = vadd.f32 %v1261_v49, %v987_v48 }
 0x234   : > { %v538_v51 = vpop.f32.mrf.mxu1 }
 0x235   : > { %v1734_v52 = vadd.f32 %v987_v48, %v538_v51 }
 0x236   : > { %v1262_v53 = vpop.f32.mrf.mxu1 }
 0x237   : > { %v1736_v54 = vadd.f32 %v1262_v53, %v987_v48 }
 0x238   : > { %v541_v55 = vpop.f32.mrf.mxu1 }
 0x239   : > { %v542_v56 = vadd.f32 %v987_v48, %v541_v55 }
 0x23a   : > { %v1265_v57 = vpop.f32.mrf.mxu1 }
 0x23b   : > { %v1738_v58 = vadd.f32 %v1265_v57, %v987_v48 }
 0x23c   : > { %v554_v59 = vpop.f32.mrf.mxu1 }
 0x23d   : > { %v555_v60 = vadd.f32 %v987_v48, %v554_v59 }
 0x23e   : > { %v1266_v61 = vpop.f32.mrf.mxu1 }
 0x23f   : > { %v1740_v62 = vadd.f32 %v1266_v61, %v987_v48 }
 0x240   : > { %v557_v63 = vpop.f32.mrf.mxu1 }
 0x241   : > { %v558_v0 = vadd.f32 %v987_v48, %v557_v63 }
 0x242   : > { %v1269_v1 = vpop.f32.mrf.mxu1 }
 0x243   : > { %v1742_v2 = vadd.f32 %v1269_v1, %v987_v48 }
 0x244   : > { %v570_v3 = vpop.f32.mrf.mxu1 }
 0x245   : > { %v571_v4 = vadd.f32 %v987_v48, %v570_v3 }
 0x246   : > { %v1270_v5 = vpop.f32.mrf.mxu1 }
 0x247   : > { %v1744_v6 = vadd.f32 %v1270_v5, %v987_v48 }
 0x248   : > { %v573_v7 = vpop.f32.mrf.mxu1 }
 0x249   : > { %v574_v8 = vadd.f32 %v987_v48, %v573_v7 }
 0x24a   : > { %v1273_v9 = vpop.f32.mrf.mxu1 }
 0x24b   : > { %v1746_v10 = vadd.f32 %v1273_v9, %v987_v48 }
 0x24c   : > { %v586_v11 = vpop.f32.mrf.mxu1 }
 0x24d   : > { %v587_v12 = vadd.f32 %v987_v48, %v586_v11  ;;  %604 = sbr.rel (%p996_p12) target bundleno = 604 (0x25c), region = 48 }
 0x24e   : > { %v1274_v13 = vpop.f32.mrf.mxu1 }
 0x24f   : > { %v1748_v14 = vadd.f32 %v1274_v13, %v987_v48 }
 0x250   : > { %v589_v15 = vpop.f32.mrf.mxu1 }
 0x251   : > { %v590_v16 = vadd.f32 %v987_v48, %v589_v15 }
 0x252   : > { %v605_v17 = vmax.f32 %v1734_v52, 0.0  ;;  %v606_v18 = vmax.f32 %v542_v56, 0.0  ;;  %v607_v19 = vmax.f32 %v1732_v50, 0.0  ;;  %v608_v20 = vmax.f32 %v1736_v54, 0.0 }
 0x253   : > { %v609_v21 = vmax.f32 %v555_v60, 0.0  ;;  %v610_v22 = vmax.f32 %v558_v0, 0.0  ;;  %v611_v23 = vmax.f32 %v1738_v58, 0.0  ;;  %v612_v24 = vmax.f32 %v1740_v62, 0.0 }
 0x254   : > { %v1088_v25 = vpack.c.bf16 %v606_v18, %v605_v17  ;;  %v1093_v26 = vpack.c.bf16 %v608_v20, %v607_v19  ;;  %v613_v27 = vmax.f32 %v571_v4, 0.0  ;;  %v614_v28 = vmax.f32 %v574_v8, 0.0 }
 0x255   : > { %v1098_v29 = vpack.c.bf16 %v610_v22, %v609_v21  ;;  %v1103_v30 = vpack.c.bf16 %v612_v24, %v611_v23  ;;  %v615_v31 = vmax.f32 %v1742_v2, 0.0  ;;  %v616_v32 = vmax.f32 %v1744_v6, 0.0 }
 0x256   : > { %1089 = vst [vmem:[#allocation3] sm:$0xff] %v1088_v25   ;;  %1165 = vst [vmem:[#allocation3 + $0x8] sm:$0xff] %v1093_v26   ;;  %v1108_v33 = vpack.c.bf16 %v614_v28, %v613_v27  ;;  %v617_v34 = vmax.f32 %v587_v12, 0.0  ;;  %v618_v35 = vmax.f32 %v590_v16, 0.0  ;;  %v619_v36 = vmax.f32 %v1746_v10, 0.0 }
 0x257   : > { %1166 = vst [vmem:[#allocation3 + $0x10] sm:$0xff] %v1098_v29   ;;  %1167 = vst [vmem:[#allocation3 + $0x18] sm:$0xff] %v1103_v30   ;;  %v1113_v37 = vpack.c.bf16 %v616_v32, %v615_v31  ;;  %v620_v38 = vmax.f32 %v1748_v14, 0.0 }
 0x258   : > { %1168 = vst [vmem:[#allocation3 + $0x20] sm:$0xff] %v1108_v33   ;;  %v1118_v39 = vpack.c.bf16 %v618_v35, %v617_v34 }
 0x259   : > { %1169 = vst [vmem:[#allocation3 + $0x28] sm:$0xff] %v1113_v37   ;;  %v1123_v40 = vpack.c.bf16 %v620_v38, %v619_v36 }
 0x25a   : > { %1170 = vst [vmem:[#allocation3 + $0x30] sm:$0xff] %v1118_v39  }
 0x25b   : > { %1171 = vst [vmem:[#allocation3 + $0x38] sm:$0xff] %v1123_v40  }
 0x25c PF: > { %p1013_p11 = scmp.ne.s32.totalorder %s1621_s19, 2 }
 0x25e   : > { %704 = sbr.rel (%p1013_p11) target bundleno = 661 (0x295), region = 52 }
 0x263   : > { %v1014_v41 = vmul.f32 -1.442695, %v1734_v52  ;;  %v1015_v42 = vmul.f32 -1.442695, %v542_v56  ;;  %v1016_v43 = vmul.f32 -1.442695, %v1732_v50 }
 0x264   : > { %v1017_v44 = vmul.f32 -1.442695, %v1736_v54  ;;  %v1018_v45 = vmul.f32 -1.442695, %v555_v60  ;;  %v1019_v46 = vmul.f32 -1.442695, %v558_v0 }
 0x265   : > { %1357 = vpow2.f32 %v1014_v41  ;;  %v1020_v47 = vmul.f32 -1.442695, %v1738_v58  ;;  %v1021_v48 = vmul.f32 -1.442695, %v1740_v62  ;;  %v1022_v49 = vmul.f32 -1.442695, %v571_v4 }
 0x266   : > { %1359 = vpow2.f32 %v1015_v42  ;;  %v1023_v51 = vmul.f32 -1.442695, %v574_v8  ;;  %v1024_v52 = vmul.f32 -1.442695, %v1742_v2  ;;  %v1025_v50 = vmul.f32 -1.442695, %v1744_v6 }
 0x267   : > { %1361 = vpow2.f32 %v1016_v43  ;;  %v1026_v53 = vmul.f32 -1.442695, %v587_v12  ;;  %v1027_v54 = vmul.f32 -1.442695, %v590_v16  ;;  %v1028_v55 = vmul.f32 -1.442695, %v1746_v10 }
 0x268   : > { %1363 = vpow2.f32 %v1017_v44  ;;  %v1029_v56 = vmul.f32 -1.442695, %v1748_v14 }
 0x269   : > { %1365 = vpow2.f32 %v1018_v45 }
 0x26a   : > { %1367 = vpow2.f32 %v1019_v46 }
 0x26b   : > { %1369 = vpow2.f32 %v1020_v47 }
 0x26c   : > { %1371 = vpow2.f32 %v1021_v48 }
 0x26d   : > { %1373 = vpow2.f32 %v1022_v49 }
 0x26e   : > { %1375 = vpow2.f32 %v1023_v51 }
 0x26f   : > { %1377 = vpow2.f32 %v1024_v52 }
 0x270   : > { %1379 = vpow2.f32 %v1025_v50 }
 0x271   : > { %1381 = vpow2.f32 %v1026_v53 }
 0x272   : > { %v1358_v57 = vpop.eup %1357  ;;  %1383 = vpow2.f32 %v1027_v54 }
 0x273   : > { %v1360_v58 = vpop.eup %1359  ;;  %v753_v59 = vadd.f32 1.0, %v1358_v57  ;;  %1385 = vpow2.f32 %v1028_v55 }
 0x274   : > { %v1362_v60 = vpop.eup %1361  ;;  %v754_v61 = vadd.f32 1.0, %v1360_v58  ;;  %1387 = vpow2.f32 %v1029_v56 }
 0x275   : > { %v1364_v62 = vpop.eup %1363  ;;  %1389 = vrcp.f32 %v753_v59  ;;  %v755_v63 = vadd.f32 1.0, %v1362_v60 }
 0x276   : > { %v1366_v0 = vpop.eup %1365  ;;  %1391 = vrcp.f32 %v754_v61  ;;  %v756_v1 = vadd.f32 1.0, %v1364_v62 }
 0x277   : > { %v1368_v2 = vpop.eup %1367  ;;  %1393 = vrcp.f32 %v755_v63  ;;  %v757_v3 = vadd.f32 1.0, %v1366_v0 }
 0x278   : > { %v1370_v4 = vpop.eup %1369  ;;  %1395 = vrcp.f32 %v756_v1  ;;  %v758_v5 = vadd.f32 1.0, %v1368_v2 }
 0x279   : > { %v1372_v6 = vpop.eup %1371  ;;  %1397 = vrcp.f32 %v757_v3  ;;  %v759_v7 = vadd.f32 1.0, %v1370_v4 }
 0x27a   : > { %v1374_v8 = vpop.eup %1373  ;;  %1399 = vrcp.f32 %v758_v5  ;;  %v760_v9 = vadd.f32 1.0, %v1372_v6 }
 0x27b   : > { %v1376_v10 = vpop.eup %1375  ;;  %1401 = vrcp.f32 %v759_v7  ;;  %v761_v11 = vadd.f32 1.0, %v1374_v8 }
 0x27c   : > { %v1378_v12 = vpop.eup %1377  ;;  %1403 = vrcp.f32 %v760_v9  ;;  %v762_v13 = vadd.f32 1.0, %v1376_v10 }
 0x27d   : > { %v1380_v14 = vpop.eup %1379  ;;  %1405 = vrcp.f32 %v761_v11  ;;  %v763_v15 = vadd.f32 1.0, %v1378_v12 }
 0x27e   : > { %v1382_v16 = vpop.eup %1381  ;;  %1407 = vrcp.f32 %v762_v13  ;;  %v764_v17 = vadd.f32 1.0, %v1380_v14 }
 0x27f   : > { %v1384_v18 = vpop.eup %1383  ;;  %1409 = vrcp.f32 %v763_v15  ;;  %v765_v19 = vadd.f32 1.0, %v1382_v16 }
 0x280   : > { %v1386_v20 = vpop.eup %1385  ;;  %1411 = vrcp.f32 %v764_v17  ;;  %v766_v21 = vadd.f32 1.0, %v1384_v18 }
 0x281   : > { %v1388_v22 = vpop.eup %1387  ;;  %1413 = vrcp.f32 %v765_v19  ;;  %v767_v23 = vadd.f32 1.0, %v1386_v20 }
 0x282   : > { %v1390_v24 = vpop.eup %1389  ;;  %1415 = vrcp.f32 %v766_v21  ;;  %v768_v25 = vadd.f32 1.0, %v1388_v22 }
 0x283   : > { %v1392_v26 = vpop.eup %1391  ;;  %1417 = vrcp.f32 %v767_v23 }
 0x284   : > { %v1394_v27 = vpop.eup %1393  ;;  %v1128_v28 = vpack.c.bf16 %v1392_v26, %v1390_v24  ;;  %1419 = vrcp.f32 %v768_v25 }
 0x285   : > { %v1396_v29 = vpop.eup %1395 }
 0x286   : > { %v1398_v30 = vpop.eup %1397  ;;  %1129 = vst [vmem:[#allocation8] sm:$0xff] %v1128_v28   ;;  %v1133_v31 = vpack.c.bf16 %v1396_v29, %v1394_v27 }
 0x287   : > { %v1400_v32 = vpop.eup %1399 }
 0x288   : > { %v1402_v33 = vpop.eup %1401  ;;  %1172 = vst [vmem:[#allocation8 + $0x8] sm:$0xff] %v1133_v31   ;;  %v1138_v34 = vpack.c.bf16 %v1400_v32, %v1398_v30 }
 0x289   : > { %v1404_v35 = vpop.eup %1403 }
 0x28a   : > { %v1406_v36 = vpop.eup %1405  ;;  %1173 = vst [vmem:[#allocation8 + $0x10] sm:$0xff] %v1138_v34   ;;  %v1143_v37 = vpack.c.bf16 %v1404_v35, %v1402_v33 }
 0x28b   : > { %v1408_v38 = vpop.eup %1407 }
 0x28c   : > { %v1410_v39 = vpop.eup %1409  ;;  %1174 = vst [vmem:[#allocation8 + $0x18] sm:$0xff] %v1143_v37   ;;  %v1148_v40 = vpack.c.bf16 %v1408_v38, %v1406_v36 }
 0x28d   : > { %v1412_v41 = vpop.eup %1411 }
 0x28e   : > { %v1414_v42 = vpop.eup %1413  ;;  %1175 = vst [vmem:[#allocation8 + $0x20] sm:$0xff] %v1148_v40   ;;  %v1153_v43 = vpack.c.bf16 %v1412_v41, %v1410_v39 }
 0x28f   : > { %v1416_v44 = vpop.eup %1415 }
 0x290   : > { %v1418_v45 = vpop.eup %1417  ;;  %1176 = vst [vmem:[#allocation8 + $0x28] sm:$0xff] %v1153_v43   ;;  %v1158_v46 = vpack.c.bf16 %v1416_v44, %v1414_v42 }
 0x291   : > { %v1420_v47 = vpop.eup %1419 }
 0x292   : > { %1177 = vst [vmem:[#allocation8 + $0x30] sm:$0xff] %v1158_v46   ;;  %v1163_v48 = vpack.c.bf16 %v1420_v47, %v1418_v45 }
 0x294   : > { %1178 = vst [vmem:[#allocation8 + $0x38] sm:$0xff] %v1163_v48  }
 0x295 PF: > { %p1292_p13 = scmp.eq.s32.totalorder %s1621_s19, 2  ;;  %s1574_s27 = smov [#allocation8]  }
 0x296   : > { %s887_s28 = sshll.u32 %s1574_s27, 4  ;;  %s888_s28 = int_to_ptr.vmem [resolvable:$true] %s887_s28 }
 0x297   : > { %s1497_s29 = scalar_lea.vmem %s888_s28, 1024  ;;  %p1504_p8 = scmp.lt.s32.totalorder %s888_s28, %s888_s28 }
 0x298   : > { %p1498_p0 = scmp.ne.s32.totalorder %s888_s28, %s1497_s29  ;;  %p1505_p9 = scmp.lt.s32.totalorder %s1497_s29, %s1497_s29 }
 0x29a   : > { %p1499_p5 = pnand %p1498_p0, %p1292_p13  ;;  %p1506_p1 = por %p1505_p9, %p1504_p8 }
 0x29c   : > { %p1500_p7 = pneg %p1499_p5 }
 0x29e   : > { %p1507_p2 = pnand %p1506_p1, %p1500_p7 }
 0x2a0   : > { %1510 = shalt.err (!%p1507_p2)
}
 0x2a1   : > { %s1575_s5 = smov 64   ;;  %s1576_s9 = smov 4  }
 0x2a2   : > { %1283 = dma.vmem_to_hbm [thread:$0]  (%p1292_p13), %s888_s28, 1024, %s1799_s4, [#allocation7], %s1575_s5, %s1575_s5, %s1576_s9  }
 0x2a3   : > { %1550 = dma.done.wait (%p1292_p13), [#allocation7], 1024  }
 0x2a4   : > { %1552 = vsyncadd (%p1292_p13), [#allocation7], 4294966272 }
 0x2a5 PF: > { %p15_p3 = scmp.ge.s32.totalorder %s1624_s20, 5   ;;  %s1814_s15 = smov %s1559_s16 }
 0x2a6   : > { %s1815_s16 = smov %s1563_s17  ;;  %s1816_s17 = smov %s1634_s23 }
 0x2a7   : > { %s1817_s18 = smov %s1624_s20  ;;  %17 = sbr.rel (!%p15_p3) target bundleno = 4 (0x4), region = 90 }
 0x2ac   :  { %903 = vsyncpa [#allocation6], 1 }
 0x2ad   :  { %905 = vsyncpa [#allocation6 + $0x1], 1 }
 0x2ae   :  { %906 = vsyncpa [#allocation7], 1 }
 0x2af   :  { %908 = vsyncpa [#allocation7 + $0x1], 1 }
 0x2b0   :  { %909 = vsyncmov [#allocation4] }
 0x2b3   :  { %s910_s19 = vpop.sfrf %909 }
 0x2b4   :  { %p1050_p4 = scmp.ne.s32.totalorder %s910_s19, 0 }
 0x2b6   :  { %914 = shalt.err (%p1050_p4)  }
 0x2b7   :  { %916 = vsyncmov [#allocation4 + $0x1] }
 0x2ba   :  { %s917_s6 = vpop.sfrf %916 }
 0x2bb   :  { %p1051_p6 = scmp.ne.s32.totalorder %s917_s6, 0 }
 0x2bd   :  { %921 = shalt.err (%p1051_p6)  }

</bundles_post_ra>
